<compile_context>
chip_gen: v5e
topology: v5e:2x2
jax: 0.10.0
libtpu: 0.0.40
codegen_flags: <defaults>
</compile_context>

<pallas_src>
import math
import functools

import jax
import jax.numpy as jnp
from jax.experimental import pallas as pl
from jax.experimental.pallas import tpu as pltpu


def _round_up(x, m):
    return ((x + m - 1) // m) * m


def _cdiv(a, b):
    return (a + b - 1) // b


def _vmem_budget():
    """(tile working-set budget, scoped vmem limit) in bytes for this chip."""
    cap = 64 << 20                          # conservative fallback (v7x-sized)
    try:
        cap = int(pltpu.get_tpu_info().vmem_capacity_bytes)
    except Exception:
        pass
    cap = max(cap, 32 << 20)
    # ~35 MiB tiles / 48 MiB limit on v7x (64 MiB VMEM per TC),
    # ~70 MiB tiles / 96 MiB limit on v5e/v6e (128 MiB VMEM).
    return int(cap * 0.55), int(cap * 0.75)


def _choose_tiles(capacity, D, F, budget_bytes):
    """Pick (TC, C_pad, TF, F_pad): row tile, padded capacity, d_ff tile, padded d_ff."""
    if F <= 512:
        f_pad = F
        tf_opts = [F]                       # full-dim block, no padding needed
    else:
        f_pad = _round_up(F, 128)
        tf_opts = sorted({t for t in range(128, f_pad + 1, 128) if f_pad % t == 0},
                         reverse=True)

    tc_opts = [t for t in (1024, 512, 256, 128, 64, 32, 16, 8)
               if t <= _round_up(capacity, 8)]
    if not tc_opts:
        tc_opts = [8]

    def working_set(tc, tf):
        return (2 * tc * D * 2              # x block  (bf16, double-buffered)
                + 2 * D * tf * 2            # w1 block (bf16, double-buffered)
                + 2 * tf * D * 2            # w2 block (bf16, double-buffered)
                + 2 * tc * D * 4            # out block (f32, double-buffered)
                + tc * tf * 6)              # h intermediate (f32 + bf16 copy)

    def finalize(tc, tf):
        # shave the row tile so padded capacity has minimal waste
        n_c = _cdiv(capacity, tc)
        tc = _round_up(_cdiv(capacity, n_c), 8)
        return tc, tc * n_c, tf, f_pad

    tc_floor = min(256, tc_opts[0])         # keep the MXU fed when possible
    for require_floor in (True, False):
        for tf in tf_opts:                  # prefer full d_ff: weights stream once/expert
            for tc in tc_opts:              # then the largest row tile that fits
                if require_floor and tc < tc_floor:
                    break
                if working_set(tc, tf) <= budget_bytes:
                    return finalize(tc, tf)
    return finalize(tc_opts[-1], tf_opts[-1])


# ----------------------------------------------------------------------------
# Pallas kernel: per-expert FFN over the dispatch buffer
# ----------------------------------------------------------------------------
def _expert_ffn_kernel(counts_ref, x_ref, w1_ref, w2_ref, o_ref, *, TC):
    e = pl.program_id(0)   # expert
    c = pl.program_id(1)   # capacity (row) tile
    f = pl.program_id(2)   # d_ff tile (reduction)

    # Output block index depends only on (e, c) -> it is resident across the f
    # reduction axis and acts as the f32 accumulator (one HBM write per block).
    @pl.when(f == 0)
    def _():
        o_ref[...] = jnp.zeros_like(o_ref)

    # Skip row tiles past this expert's routed-token fill level (padding rows).
    # (The block DMAs still run; only the MXU/VPU work is skipped.)
    @pl.when(counts_ref[e] > c * TC)
    def _():
        h = jnp.dot(x_ref[...], w1_ref[...],
                    preferred_element_type=jnp.float32)        # bf16 x bf16 -> f32
        h = jnp.maximum(h, 0.0).astype(jnp.bfloat16)
        o_ref[...] += jnp.dot(h, w2_ref[...],
                              preferred_element_type=jnp.float32)


def expert_ffn_pallas(xd, w1, w2, counts, *, TC, TF, vmem_limit):
    """out[e, c] = relu(xd[e, c] @ w1[e]) @ w2[e]   (unweighted, f32)."""
    E, C_pad, D = xd.shape
    F_pad = w1.shape[2]
    n_c = C_pad // TC
    n_f = F_pad // TF

    return pl.pallas_call(
        functools.partial(_expert_ffn_kernel, TC=TC),
        out_shape=jax.ShapeDtypeStruct((E, C_pad, D), jnp.float32),
        grid_spec=pltpu.PrefetchScalarGridSpec(
            num_scalar_prefetch=1,
            grid=(E, n_c, n_f),
            in_specs=[
                # dispatched tokens of expert e, row tile c (resident across f)
                pl.BlockSpec((pl.Squeezed(), TC, D), lambda e, c, f, cnt: (e, c, 0)),
                # expert weights; block index ignores c, so when n_f == 1 the
                # DMA is deduped and each expert's weights stream exactly once
                pl.BlockSpec((pl.Squeezed(), D, TF), lambda e, c, f, cnt: (e, 0, f)),
                pl.BlockSpec((pl.Squeezed(), TF, D), lambda e, c, f, cnt: (e, f, 0)),
            ],
            out_specs=pl.BlockSpec((pl.Squeezed(), TC, D),
                                   lambda e, c, f, cnt: (e, c, 0)),
        ),
        compiler_params=pltpu.CompilerParams(
            dimension_semantics=("parallel", "parallel", "arbitrary"),
            vmem_limit_bytes=vmem_limit),
    )(counts, xd, w1, w2)


# ----------------------------------------------------------------------------
# Routing (top-k + capacity dropping), matching the PyTorch module
# ----------------------------------------------------------------------------
def _routing(x_flat, w_gate, k, capacity_factor):
    N, _ = x_flat.shape
    E = w_gate.shape[0]
    gate_logits = (x_flat @ w_gate.T).astype(jnp.float32)            # (N, E)
    # TODO(synk): training-mode gating noise (randn * noise_std) omitted (eval path).
    topk_scores, topk_idx = jax.lax.top_k(gate_logits, k)            # (N, k)
    probs = jax.nn.softmax(topk_scores, axis=-1)

    capacity = math.ceil(capacity_factor * N / E)
    flat_idx = topk_idx.reshape(-1).astype(jnp.int32)                # (N*k,)
    one_hot = jax.nn.one_hot(flat_idx, E, dtype=jnp.float32)
    cum = jnp.cumsum(one_hot, axis=0)                                # token-major order
    pos = jnp.take_along_axis(cum, flat_idx[:, None], axis=1)[:, 0].astype(jnp.int32) - 1
    keep = pos < capacity                                            # == cum <= capacity
    probs = probs * keep.reshape(N, k).astype(probs.dtype)
    probs = probs / (probs.sum(axis=-1, keepdims=True) + 1e-9)
    return probs, topk_idx, flat_idx, pos, keep, one_hot, capacity


# ----------------------------------------------------------------------------
# Full forward (routing / dispatch / combine glue in XLA, FFN hot path in Pallas)
# ----------------------------------------------------------------------------
def moe_forward(x, params, *, k=2, capacity_factor=1.25):
    B, S, D = x.shape
    E, _, F = params["w1"].shape
    N = B * S
    x_flat = x.reshape(N, D)

    probs, topk_idx, flat_idx, pos, keep, one_hot, capacity = _routing(
        x_flat, params["w_gate"], k, capacity_factor)
    flat_probs = probs.reshape(-1)

    # --- dispatch: scatter kept slots into the (E, C_pad, D) capacity buffer --
    budget, vmem_limit = _vmem_budget()
    TC, C_pad, TF, F_pad = _choose_tiles(capacity, D, F, budget)

    token_idx = jnp.arange(N * k, dtype=jnp.int32) // k              # token of each slot
    rows = flat_idx * C_pad + pos                                    # (expert, slot) -> row
    rows = jnp.where(keep, rows, E * C_pad)                          # dropped -> OOB

    x_bf = x_flat.astype(jnp.bfloat16)
    xd = jnp.zeros((E * C_pad, D), jnp.bfloat16).at[rows].set(
        x_bf[token_idx], mode="drop").reshape(E, C_pad, D)
    counts = jnp.sum(one_hot * keep.astype(jnp.float32)[:, None],
                     axis=0).astype(jnp.int32)                       # routed rows / expert

    w1 = params["w1"].astype(jnp.bfloat16)
    w2 = params["w2"].astype(jnp.bfloat16)
    if F_pad != F:
        w1 = jnp.pad(w1, ((0, 0), (0, 0), (0, F_pad - F)))
        w2 = jnp.pad(w2, ((0, 0), (0, F_pad - F), (0, 0)))

    # --- hot path: per-expert FFN over the dispatch buffer (Pallas) ----------
    y_buf = expert_ffn_pallas(xd, w1, w2, counts,
                              TC=TC, TF=TF, vmem_limit=vmem_limit)   # (E, C_pad, D) f32

    # --- combine: gather each slot's row, weighted sum over k (index_add) ----
    row_idx = jnp.where(keep, rows, 0).reshape(N, k)
    gathered = y_buf.reshape(E * C_pad, D)[row_idx]                  # (N, k, D) f32
    y_flat = jnp.einsum("nk,nkd->nd", probs, gathered)               # dropped slots weigh 0
    y = y_flat.astype(x.dtype).reshape(B, S, D)

    # --- switch-style auxiliary load-balance loss for this batch -------------
    routed = (flat_probs > 0).astype(jnp.float32)
    routed_counts = jnp.sum(one_hot * routed[:, None], axis=0)       # post-capacity bincount
    importance = jnp.sum(one_hot * flat_probs[:, None], axis=0)
    tokens_frac = routed_counts / (routed_counts.sum() + 1e-9)
    importance_frac = importance / (importance.sum() + 1e-9)
    aux_loss = jnp.sum(tokens_frac * importance_frac) * E

    # TODO(synk): persistent buffer / EMA statistics (_total_tokens, _token_counts,
    # _gate_selection_counts, _ema_importance) are stateful bookkeeping; omitted.
    return y, aux_loss


# ----------------------------------------------------------------------------
def _reference_combine(x_flat, w1, w2, combine):
    """Pure-JAX reference matching the kernel's bf16-operand / f32-accum math."""
    E = w1.shape[0]
    xb = x_flat.astype(jnp.bfloat16)
    y = jnp.zeros(x_flat.shape, jnp.float32)
    for e in range(E):
        h = jnp.dot(xb, w1[e].astype(jnp.bfloat16),
                    preferred_element_type=jnp.float32)
        h = jnp.maximum(h, 0.0).astype(jnp.bfloat16)
        out = jnp.dot(h, w2[e].astype(jnp.bfloat16),
                      preferred_element_type=jnp.float32)
        y = y + combine[:, e:e + 1] * out
    return y


if __name__ == "__main__":
    B, S, D, F, E, K = 2, 8, 32, 64, 4, 2
    key = jax.random.PRNGKey(0)
    kx, kg, k1, k2 = jax.random.split(key, 4)

    x = jax.random.normal(kx, (B, S, D), dtype=jnp.float32)
    params = {
        # nn.Linear default init: U(-1/sqrt(fan_in), 1/sqrt(fan_in)), no bias
        "w_gate": jax.random.uniform(kg, (E, D), jnp.float32,
                                     -1.0 / math.sqrt(D), 1.0 / math.sqrt(D)),
        "w1": jax.random.uniform(k1, (E, D, F), jnp.float32,
                                 -1.0 / math.sqrt(D), 1.0 / math.sqrt(D)),
        "w2": jax.random.uniform(k2, (E, F, D), jnp.float32,
                                 -1.0 / math.sqrt(F), 1.0 / math.sqrt(F)),
    }

    fwd = jax.jit(functools.partial(moe_forward, k=K, capacity_factor=1.25))
    y, aux = fwd(x, params)
    jax.block_until_ready((y, aux))

    # sanity check: Pallas grouped dispatch/FFN/combine vs a dense plain-JAX reference
    x_flat = x.reshape(-1, D)
    probs, topk_idx, *_ = _routing(x_flat, params["w_gate"], K, 1.25)
    comb = jnp.einsum("nk,nke->ne", probs,
                      jax.nn.one_hot(topk_idx, E, dtype=probs.dtype))
    y_ref = _reference_combine(x_flat, params["w1"], params["w2"], comb)

    err = float(jnp.max(jnp.abs(y.reshape(-1, D).astype(jnp.float32) - y_ref)))
    assert err < 5e-3, f"max abs err {err}"
    assert y.shape == (B, S, D) and aux.shape == ()

    print("KERNEL_OK")
</pallas_src>

<mosaic_0001>
module attributes {stable_mosaic.version = 11 : i64} {
  func.func @_expert_ffn_kernel(%arg0: i32, %arg1: i32, %arg2: i32, %arg3: memref<4xi32, #tpu.memory_space<smem>>, %arg4: memref<1x8x32xbf16, #tpu.memory_space<vmem>>, %arg5: memref<1x32x64xbf16, #tpu.memory_space<vmem>>, %arg6: memref<1x64x32xbf16, #tpu.memory_space<vmem>>, %arg7: memref<1x8x32xf32, #tpu.memory_space<vmem>>) attributes {dimension_semantics = [#tpu.dimension_semantics<parallel>, #tpu.dimension_semantics<parallel>, #tpu.dimension_semantics<arbitrary>], iteration_bounds = array<i64: 4, 1, 1>, scalar_prefetch = 1 : i64, scratch_operands = 0 : i64, tpu.core_type = #tpu.core_type<tc>, window_params = [{transform_indices = @transform_0, window_bounds = array<i64: 1, 8, 32>}, {transform_indices = @transform_1, window_bounds = array<i64: 1, 32, 64>}, {transform_indices = @transform_2, window_bounds = array<i64: 1, 64, 32>}, {transform_indices = @transform_3, window_bounds = array<i64: 1, 8, 32>}]} {
    %c0_i32 = arith.constant 0 : i32
    %0 = arith.cmpi eq, %arg2, %c0_i32 : i32
    %1 = arith.extui %0 : i1 to i32
    %c0_i32_0 = arith.constant 0 : i32
    %2 = arith.cmpi ne, %1, %c0_i32_0 : i32
    scf.if %2 {
      %cst = arith.constant 0.000000e+00 : f32
      %9 = vector.broadcast %cst : f32 to vector<8x32xf32>
      %c0 = arith.constant 0 : index
      %c0_2 = arith.constant 0 : index
      %c0_3 = arith.constant 0 : index
      %10 = vector.load %arg7[%c0, %c0_2, %c0_3] : memref<1x8x32xf32, #tpu.memory_space<vmem>>, vector<1x8x32xf32>
      %11 = vector.shape_cast %10 : vector<1x8x32xf32> to vector<8x32xf32>
      %12 = vector.shape_cast %9 : vector<8x32xf32> to vector<1x8x32xf32>
      tpu.vector_store %arg7[%c0, %c0_2, %c0_3], %12 {strides = array<i32>} : memref<1x8x32xf32, #tpu.memory_space<vmem>>, vector<1x8x32xf32>,
    } else {
    }
    %3 = arith.index_cast %arg0 : i32 to index
    %4 = memref.load %arg3[%3] : memref<4xi32, #tpu.memory_space<smem>>
    %c8_i32 = arith.constant 8 : i32
    %5 = arith.muli %arg1, %c8_i32 : i32
    %6 = arith.cmpi sgt, %4, %5 : i32
    %7 = arith.extui %6 : i1 to i32
    %c0_i32_1 = arith.constant 0 : i32
    %8 = arith.cmpi ne, %7, %c0_i32_1 : i32
    scf.if %8 {
      %c0 = arith.constant 0 : index
      %c0_2 = arith.constant 0 : index
      %c0_3 = arith.constant 0 : index
      %9 = vector.load %arg4[%c0, %c0_2, %c0_3] : memref<1x8x32xbf16, #tpu.memory_space<vmem>>, vector<1x8x32xbf16>
      %10 = vector.shape_cast %9 : vector<1x8x32xbf16> to vector<8x32xbf16>
      %c0_4 = arith.constant 0 : index
      %c0_5 = arith.constant 0 : index
      %c0_6 = arith.constant 0 : index
      %11 = vector.load %arg5[%c0_4, %c0_5, %c0_6] : memref<1x32x64xbf16, #tpu.memory_space<vmem>>, vector<1x32x64xbf16>
      %12 = vector.shape_cast %11 : vector<1x32x64xbf16> to vector<32x64xbf16>
      %cst = arith.constant dense<0.000000e+00> : vector<8x64xf32>
      %13 = tpu.matmul %10, %12, %cst {dimension_numbers = #tpu.dot_dimension_numbers<[1], [0], [0], [1], [0, 0, 1, 1], [], []>} : vector<8x32xbf16>, vector<32x64xbf16>, vector<8x64xf32> -> vector<8x64xf32>
      %cst_7 = arith.constant 0.000000e+00 : f32
      %14 = vector.broadcast %cst_7 : f32 to vector<8x64xf32>
      %15 = arith.maximumf %13, %14 : vector<8x64xf32>
      %16 = arith.truncf %15 : vector<8x64xf32> to vector<8x64xbf16>
      %c0_8 = arith.constant 0 : index
      %c0_9 = arith.constant 0 : index
      %c0_10 = arith.constant 0 : index
      %17 = vector.load %arg7[%c0_8, %c0_9, %c0_10] : memref<1x8x32xf32, #tpu.memory_space<vmem>>, vector<1x8x32xf32>
      %18 = vector.shape_cast %17 : vector<1x8x32xf32> to vector<8x32xf32>
      %c0_11 = arith.constant 0 : index
      %c0_12 = arith.constant 0 : index
      %c0_13 = arith.constant 0 : index
      %19 = vector.load %arg6[%c0_11, %c0_12, %c0_13] : memref<1x64x32xbf16, #tpu.memory_space<vmem>>, vector<1x64x32xbf16>
      %20 = vector.shape_cast %19 : vector<1x64x32xbf16> to vector<64x32xbf16>
      %cst_14 = arith.constant dense<0.000000e+00> : vector<8x32xf32>
      %21 = tpu.matmul %16, %20, %cst_14 {dimension_numbers = #tpu.dot_dimension_numbers<[1], [0], [0], [1], [0, 0, 1, 1], [], []>} : vector<8x64xbf16>, vector<64x32xbf16>, vector<8x32xf32> -> vector<8x32xf32>
      %22 = arith.addf %18, %21 : vector<8x32xf32>
      %c0_15 = arith.constant 0 : index
      %c0_16 = arith.constant 0 : index
      %c0_17 = arith.constant 0 : index
      %23 = vector.load %arg7[%c0_15, %c0_16, %c0_17] : memref<1x8x32xf32, #tpu.memory_space<vmem>>, vector<1x8x32xf32>
      %24 = vector.shape_cast %23 : vector<1x8x32xf32> to vector<8x32xf32>
      %25 = vector.shape_cast %22 : vector<8x32xf32> to vector<1x8x32xf32>
      tpu.vector_store %arg7[%c0_15, %c0_16, %c0_17], %25 {strides = array<i32>} : memref<1x8x32xf32, #tpu.memory_space<vmem>>, vector<1x8x32xf32>,
    } else {
    }
    return
  }
  func.func @transform_0(%arg0: i32, %arg1: i32, %arg2: i32, %arg3: memref<4xi32, #tpu.memory_space<smem>>) -> (i32, i32, i32) {
    %c0_i32 = arith.constant 0 : i32
    %c0_i32_0 = arith.constant 0 : i32
    return %arg0, %arg1, %c0_i32 : i32, i32, i32
  }
  func.func @transform_1(%arg0: i32, %arg1: i32, %arg2: i32, %arg3: memref<4xi32, #tpu.memory_space<smem>>) -> (i32, i32, i32) {
    %c0_i32 = arith.constant 0 : i32
    %c0_i32_0 = arith.constant 0 : i32
    return %arg0, %c0_i32, %arg2 : i32, i32, i32
  }
  func.func @transform_2(%arg0: i32, %arg1: i32, %arg2: i32, %arg3: memref<4xi32, #tpu.memory_space<smem>>) -> (i32, i32, i32) {
    %c0_i32 = arith.constant 0 : i32
    %c0_i32_0 = arith.constant 0 : i32
    return %arg0, %arg2, %c0_i32 : i32, i32, i32
  }
  func.func @transform_3(%arg0: i32, %arg1: i32, %arg2: i32, %arg3: memref<4xi32, #tpu.memory_space<smem>>) -> (i32, i32, i32) {
    %c0_i32 = arith.constant 0 : i32
    %c0_i32_0 = arith.constant 0 : i32
    return %arg0, %arg1, %c0_i32 : i32, i32, i32
  }
}

</mosaic_0001>

<bundles_post_ra>
// kernel: eq.1
= control target key start
LH: loop header
LB: loop body
LE: loop exit
PB: predicated region body
PF: predicated region fallthrough
CT: control target
= control target key end

     0   :  { %s131_s10 = smov 30   ;;  %s132_s11 = smov 26   ;;  %vm3_vm0 = vcmask 15360   ;;  %vm9_vm1 = vcmask 261360   ;;  %vm15_vm2 = vcmask 244960   ;;  %vm21_vm3 = vcmask 228560   ;;  %s207_s0 = inlined_call_operand.vmem [shape: s32[16,2], index: 0, kind: input, shape index: {}]   ;;  %s208_s1 = inlined_call_operand.vmem [shape: s32[32], index: 1, kind: output, shape index: {}]  }
   0x1   :  { %v101_v0 = vld [vmem:[%s207_s0 + $0xf] sm:$0x1]   ;;  %v103_v1 = vld [vmem:[%s207_s0 + $0xd] sm:$0x1]   ;;  %v105_v2 = vld [vmem:[%s207_s0 + $0xb] sm:$0x1]  }
   0x2   :  { %7 = vrot.lane.b32.xlu0 %v101_v0, %s131_s10  ;;  %19 = vrot.lane.b32.xlu1 %v103_v1, %s132_s11  ;;  %s133_s14 = smov 22   ;;  %v102_v3 = vld [vmem:[%s207_s0 + $0xe] sm:$0x1]   ;;  %v104_v4 = vld [vmem:[%s207_s0 + $0xc] sm:$0x1]   ;;  %s134_s19 = smov 28  }
   0x3   :  { %31 = vrot.lane.b32.xlu2 %v105_v2, %s133_s14  ;;  %s135_s20 = smov 24   ;;  %v106_v5 = vld [vmem:[%s207_s0 + $0xa] sm:$0x1]   ;;  %s136_s23 = smov 20   ;;  %v107_v6 = vld [vmem:[%s207_s0 + $0x9] sm:$0x1]  }
   0x4   :  { %v108_v7 = vld [vmem:[%s207_s0 + $0x8] sm:$0x1]   ;;  %s137_s28 = smov 18   ;;  %s138_s29 = smov 16   ;;  %v109_v8 = vld [vmem:[%s207_s0 + $0x7] sm:$0x1]  }
   0x5   :  { %s139_s3 = smov 14   ;;  %v110_v9 = vld [vmem:[%s207_s0 + $0x6] sm:$0x1]   ;;  %v111_v10 = vld [vmem:[%s207_s0 + $0x5] sm:$0x1]   ;;  %s140_s8 = smov 12  }
   0x6   :  { %s141_s9 = smov 10   ;;  %v112_v11 = vld [vmem:[%s207_s0 + $0x4] sm:$0x1]   ;;  %s142_s12 = smov 8   ;;  %v113_v12 = vld [vmem:[%s207_s0 + $0x3] sm:$0x1]  }
   0x7   :  { %v114_v13 = vld [vmem:[%s207_s0 + $0x2] sm:$0x1]   ;;  %s143_s17 = smov 6   ;;  %s144_s18 = smov 4   ;;  %v115_v14 = vld [vmem:[%s207_s0 + $0x1] sm:$0x1]  }
   0x8   :  { %s145_s21 = smov 2   ;;  %v2_v15 = vld [vmem:[%s207_s0] sm:$0x1]   ;;  %vm27_vm4 = vcmask 212160   ;;  %vm33_vm5 = vcmask 195760   ;;  %vm39_vm6 = vcmask 179360  }
   0x9   :  { %4 = vst.msk [vmem:[#allocation0] sm:$0x1] %vm3_vm0, %v2_v15   ;;  %vm45_vm7 = vcmask 162960   ;;  %vm51_vm8 = vcmask 146560   ;;  %vm57_vm9 = vcmask 130160   ;;  %vm63_vm10 = vcmask 113760  }
   0xa   :  { %13 = vrot.lane.b32.xlu0 %v102_v3, %s134_s19  ;;  %25 = vrot.lane.b32.xlu1 %v104_v4, %s135_s20  ;;  %vm69_vm11 = vcmask 97360   ;;  %vm75_vm12 = vcmask 80960   ;;  %vm81_vm13 = vcmask 64560   ;;  %vm87_vm14 = vcmask 48160  }
   0xb   :  { %37 = vrot.lane.b32.xlu2 %v106_v5, %s136_s23  ;;  %vm93_vm15 = vcmask 31760  }
  0x12   :  { %43 = vrot.lane.b32.xlu0 %v107_v6, %s137_s28  ;;  %49 = vrot.lane.b32.xlu1 %v108_v7, %s138_s29 }
  0x13   :  { %55 = vrot.lane.b32.xlu2 %v109_v8, %s139_s3 }
  0x1a   :  { %61 = vrot.lane.b32.xlu0 %v110_v9, %s140_s8  ;;  %67 = vrot.lane.b32.xlu1 %v111_v10, %s141_s9 }
  0x1b   :  { %73 = vrot.lane.b32.xlu2 %v112_v11, %s142_s12 }
  0x22   :  { %79 = vrot.lane.b32.xlu0 %v113_v12, %s143_s17  ;;  %85 = vrot.lane.b32.xlu1 %v114_v13, %s144_s18 }
  0x23   :  { %91 = vrot.lane.b32.xlu2 %v115_v14, %s145_s21 }
  0x5d   :  { %v32_v16 = vpop.permute.xlu2 %31  }
  0x65   :  { %v38_v17 = vpop.permute.xlu2 %37  }
  0x6d   :  { %v56_v18 = vpop.permute.xlu2 %55  }
  0x74   :  { %v8_v19 = vpop.permute.xlu0 %7   ;;  %v20_v20 = vpop.permute.xlu1 %19  }
  0x75   :  { %10 = vst.msk [vmem:[#allocation0] sm:$0x1] %vm9_vm1, %v8_v19   ;;  %v74_v21 = vpop.permute.xlu2 %73  }
  0x7c   :  { %v14_v22 = vpop.permute.xlu0 %13   ;;  %v26_v23 = vpop.permute.xlu1 %25  }
  0x7d   :  { %16 = vst.msk [vmem:[#allocation0] sm:$0x1] %vm15_vm2, %v14_v22   ;;  %v92_v24 = vpop.permute.xlu2 %91  }
  0x7e   :  { %22 = vst.msk [vmem:[#allocation0] sm:$0x1] %vm21_vm3, %v20_v20  }
  0x7f   :  { %28 = vst.msk [vmem:[#allocation0] sm:$0x1] %vm27_vm4, %v26_v23  }
  0x80   :  { %34 = vst.msk [vmem:[#allocation0] sm:$0x1] %vm33_vm5, %v32_v16  }
  0x81   :  { %40 = vst.msk [vmem:[#allocation0] sm:$0x1] %vm39_vm6, %v38_v17  }
  0x84   :  { %v44_v25 = vpop.permute.xlu0 %43   ;;  %v50_v26 = vpop.permute.xlu1 %49  }
  0x85   :  { %46 = vst.msk [vmem:[#allocation0] sm:$0x1] %vm45_vm7, %v44_v25  }
  0x86   :  { %52 = vst.msk [vmem:[#allocation0] sm:$0x1] %vm51_vm8, %v50_v26  }
  0x87   :  { %58 = vst.msk [vmem:[#allocation0] sm:$0x1] %vm57_vm9, %v56_v18  }
  0x8c   :  { %v62_v27 = vpop.permute.xlu0 %61   ;;  %v68_v28 = vpop.permute.xlu1 %67  }
  0x8d   :  { %64 = vst.msk [vmem:[#allocation0] sm:$0x1] %vm63_vm10, %v62_v27  }
  0x8e   :  { %70 = vst.msk [vmem:[#allocation0] sm:$0x1] %vm69_vm11, %v68_v28  }
  0x8f   :  { %76 = vst.msk [vmem:[#allocation0] sm:$0x1] %vm75_vm12, %v74_v21  }
  0x94   :  { %v80_v29 = vpop.permute.xlu0 %79   ;;  %v86_v30 = vpop.permute.xlu1 %85  }
  0x95   :  { %82 = vst.msk [vmem:[#allocation0] sm:$0x1] %vm81_vm13, %v80_v29  }
  0x96   :  { %88 = vst.msk [vmem:[#allocation0] sm:$0x1] %vm87_vm14, %v86_v30  }
  0x97   :  { %94 = vst.msk [vmem:[#allocation0] sm:$0x1] %vm93_vm15, %v92_v24  }
  0x9e   :  { %v97_v31 = vld [vmem:[#allocation0] sm:$0x1] }
  0x9f   :  { %100 = vst [vmem:[%s208_s1] sm:$0x1] %v97_v31 }

// kernel: moe_forward.1
= control target key start
LH: loop header
LB: loop body
LE: loop exit
PB: predicated region body
PF: predicated region fallthrough
CT: control target
= control target key end

     0   :  { %s606_s18 = smov [#allocation3]   ;;  %s678_s0 = inlined_call_operand.vmem [shape: s32[4], index: 0, kind: input, shape index: {}]   ;;  %s679_s1 = inlined_call_operand.vmem [shape: bf16[4,8,32], index: 1, kind: input, shape index: {}]   ;;  %s680_s2 = inlined_call_operand.vmem [shape: bf16[4,32,64], index: 2, kind: input, shape index: {}]   ;;  %s681_s3 = inlined_call_operand.vmem [shape: bf16[4,64,32], index: 3, kind: input, shape index: {}]   ;;  %s682_s4 = inlined_call_operand.vmem [shape: f32[4,8,32], index: 4, kind: output, shape index: {}]  }
   0x1   :  { %s10_s17 = sshll.u32 %s678_s0, 4  ;;  %s11_s17 = int_to_ptr.vmem [resolvable:$true] %s10_s17 }
   0x2   :  { %13 = dma.vmem_to_smem %s11_s17, 16, %s606_s18, [#allocation2] }
   0x3   :  { %592 = dma.done.wait [#allocation2], 16 }
   0x4   :  { %593 = vsyncadd [#allocation2], 4294967280 }
   0x5   :  { %16 = sfence }
   0x6   :  { %s636_s19 = smov 0   ;;  %s638_s20 = smov 0  }
   0x7   :  { %s640_s21 = smov 0  }
   0x8 LB: > { %s41_s0 = sadd.s32 1, %s600_s20  ;;  %p498_p0 = scmp.ge.s32.totalorder %s604_s21, 1  ;;  %s604_s21 = sphi %s640_s21, %s22_s21   ;;  %s600_s20 = sphi %s638_s20, %s684_s20   ;;  %s596_s19 = sphi %s636_s19, %s683_s19  }
   0x9   : > { %p43_p1 = scmp.ge.s32.totalorder %s41_s0, 4  ;;  %p203_p2 = scmp.lt.s32.totalorder %s604_s21, 5 }
   0xb   : > { %s686_s0 = smov (%p43_p1, %s41_s0), 0  ;;  %p204_p3 = pnand %p498_p0, %p203_p2 }
   0xc   : > { %p248_p4 = scmp.lt.s32.totalorder (!%p204_p3), %s596_s19, 3  ;;  %s287_s22 = sld [smem:[#allocation3 + %s596_s19]] (!%p204_p3) }
   0xd   : > { %207 = sbr.rel (%p204_p3) target bundleno = 300 (0x12c), region = 32 }
  0x12   : > { %s688_s19 = smov (!%p248_p4, %s596_s19), 3  ;;  %vm285_vm0 = vcmask 261120   ;;  %v607_v0 = vmov 0.0   ;;  %p505_p5 = scmp.le.s32.totalorder %s287_s22, 0 }
  0x13   : > { %s499_s23 = sshll.u32 %s688_s19, 2  ;;  %s534_s24 = sshll.u32 %s688_s19, 4 }
  0x14   : > { %s254_s27 = scalar_lea.vmem %s679_s1, %s499_s23  ;;  %s262_s30 = scalar_lea.vmem %s680_s2, %s534_s24 }
  0x15   : > { %s535_s5 = sshll.u32 %s688_s19, 5  ;;  %s504_s6 = sshll.u32 %s688_s19, 3 }
  0x16   : > { %s271_s9 = scalar_lea.vmem %s681_s3, %s535_s5  ;;  %s279_s12 = scalar_lea.vmem %s682_s4, %s504_s6 }
  0x17   : > { %286 = vst.msk [vmem:[%s279_s12] sm:$0xff] %vm285_vm0, %v607_v0  ;;  %292 = sbr.rel (%p505_p5) target bundleno = 300 (0x12c), region = 40 }
  0x1c   : > { %v537_v1 = vld [vmem:[%s262_s30 + $0x8] sm:$0xff]  ;;  %v541_v2 = vld [vmem:[%s271_s9 + $0x18] sm:$0xff]  ;;  %v536_v3 = vld [vmem:[%s262_s30] sm:$0xff]  ;;  %vm362_vm1 = vcmask 523264  }
  0x1d   : > { %320 = vmatpush.bf16.msra.mxu0 %v537_v1  ;;  %370 = vmatpush.bf16.msra.mxu1 %v541_v2  ;;  %v540_v4 = vld [vmem:[%s271_s9 + $0x10] sm:$0xff]  ;;  %v293_v5 = vld [vmem:[%s254_s27] sm:$0xf]  ;;  %v539_v6 = vld [vmem:[%s271_s9 + $0x8] sm:$0xff] }
  0x1e   : > { %v538_v7 = vld [vmem:[%s271_s9] sm:$0xff] }
  0x1f   : > { %v329_v12 = vld [vmem:[%s279_s12] sm:$0xff] }
  0x21   : > { %321 = vmatpush.bf16.msra.mxu0 %v536_v3  ;;  %371 = vmatpush.bf16.msra.mxu1 %v540_v4 }
  0x24   : > { %514 = vmatmul.msk.bf16.vlgmr.msra.gmra.mxu0 %vm285_vm0, %v293_v5 }
  0x25   : > { %372 = vmatpush.bf16.msra.mxu1 %v539_v6 }
  0x29   : > { %373 = vmatpush.bf16.msra.mxu1 %v538_v7 }
  0xa1   : > { %v323_v8 = vpop.f32.mrf.mxu0 }
  0xa2   : > { %v327_v9 = vmax.f32 %v323_v8, 0.0 }
  0xa4   : > { %v328_v10 = vpack.c.bf16 %v327_v9, %v327_v9 }
  0xa6   : > { %531 = vmatmul.msk.bf16.vlgmr.msra.gmra.mxu1 %vm362_vm1, %v328_v10 }
  0xa9   : > { %v325_v11 = vpop.f32.mrf.mxu0 }
 0x123   : > { %v375_v13 = vpop.f32.mrf.mxu1 }
 0x124   : > { %v379_v14 = vadd.f32 %v375_v13, %v329_v12 }
 0x126   : > { %380 = vst.msk [vmem:[%s279_s12] sm:$0xff] %vm285_vm0, %v379_v14 }
 0x12b   : > { %v377_v15 = vpop.f32.mrf.mxu1 }
 0x12c PF: > { %s22_s21 = sadd.s32 1, %s604_s21   ;;  %s683_s19 = smov %s600_s20 }
 0x12d   : > { %p19_p6 = scmp.ge.s32.totalorder %s22_s21, 6   ;;  %s684_s20 = smov %s686_s0 }
 0x12f   :  { %21 = sbr.rel (!%p19_p6) target bundleno = 8 (0x8), region = 76 }

</bundles_post_ra>
